<compile_context>
chip_gen: v5e
topology: v5e:2x2
jax: 0.10.0
libtpu: 0.0.40
codegen_flags: <defaults>
</compile_context>

<pallas_src>
import functools

import jax
import jax.numpy as jnp
from jax import lax
from jax.experimental import pallas as pl
from jax.experimental.pallas import tpu as pltpu

LANES = 128
CHUNK = 16            # rows per inner-loop step: 1 bf16 vreg / 2 f32 vregs per tensor
MAX_TILE_R_32 = 4096  # 4096 x 128 x 4B = 2 MiB per input buffer (f32/int32)
MAX_TILE_R_16 = 8192  # 8192 x 128 x 2B = 2 MiB per input buffer (bf16/f16)


def _tile_partials(yt_ref, yp_ref, out_ref, n_chunks):
    """Accumulate partials over the first n_chunks*CHUNK rows of this tile."""

    def step(c, carry):
        s, mnt, mxt, mnp_, mxp_ = carry
        r0 = pl.multiple_of(c * CHUNK, CHUNK)
        yt = yt_ref[pl.ds(r0, CHUNK), :].astype(jnp.float32)
        yp = yp_ref[pl.ds(r0, CHUNK), :].astype(jnp.float32)
        yt3 = yt.reshape(CHUNK // 8, 8, LANES)
        yp3 = yp.reshape(CHUNK // 8, 8, LANES)
        d = yt3 - yp3
        s = s + jnp.sum(d * d, axis=0)
        # "tensor == -1 everywhere" <=> (min == -1) & (max == -1); cheaper than
        # max|x + 1| (no add/abs).  Reduced to a flag once, in the JAX epilogue.
        mnt = jnp.minimum(mnt, jnp.min(yt3, axis=0))
        mxt = jnp.maximum(mxt, jnp.max(yt3, axis=0))
        mnp_ = jnp.minimum(mnp_, jnp.min(yp3, axis=0))
        mxp_ = jnp.maximum(mxp_, jnp.max(yp3, axis=0))
        return s, mnt, mxt, mnp_, mxp_

    # -1 is the neutral init for the min/max sentinel partials (same argument
    # as padding with -1): any real element != -1 still flips min or max.
    neutral = jnp.full((8, LANES), -1.0, dtype=jnp.float32)
    init = (jnp.zeros((8, LANES), jnp.float32), neutral, neutral, neutral, neutral)
    s, mnt, mxt, mnp_, mxp_ = lax.fori_loop(
        0, n_chunks, step, init, unroll=min(8, n_chunks))

    # Pack all partials into one lane-dense (40, 128) block -> single writeback.
    out_ref[0:8, :] = s
    out_ref[8:16, :] = mnt
    out_ref[16:24, :] = mxt
    out_ref[24:32, :] = mnp_
    out_ref[32:40, :] = mxp_


def _partials_kernel(yt_ref, yp_ref, out_ref, *, num_blocks, chunks_full, chunks_last):
    if chunks_last == chunks_full:
        # Every block is full -> single code path.
        _tile_partials(yt_ref, yp_ref, out_ref, chunks_full)
    else:
        i = pl.program_id(0)

        @pl.when(i < num_blocks - 1)
        def _():
            _tile_partials(yt_ref, yp_ref, out_ref, chunks_full)

        @pl.when(i == num_blocks - 1)
        def _():
            # Statically shorter loop on the last (partial) block: the stale
            # region of the VMEM buffer is simply never read.
            _tile_partials(yt_ref, yp_ref, out_ref, chunks_last)


def custom_value_distance_loss(y_true, y_pred):
    """0.5 * mean((y_true - y_pred)^2), or 0 if either tensor is identically -1."""
    y_true = jnp.asarray(y_true)
    y_pred = jnp.asarray(y_pred)
    assert y_true.shape == y_pred.shape, "y_true / y_pred must match in shape"
    dtype = jnp.promote_types(y_true.dtype, y_pred.dtype)
    y_true = y_true.astype(dtype)   # no forced f32: bf16 stays bf16 in HBM
    y_pred = y_pred.astype(dtype)

    total = y_true.size
    lane_pad = (-total) % LANES
    if lane_pad:
        # TODO(synk): sizes with total % 128 != 0 cannot be expressed as a free
        # reshape; this rare path still materializes one -1-padded copy.
        flat_t = jnp.pad(y_true.reshape(-1), (0, lane_pad), constant_values=-1)
        flat_p = jnp.pad(y_pred.reshape(-1), (0, lane_pad), constant_values=-1)
    else:
        flat_t = y_true.reshape(-1)   # zero-copy
        flat_p = y_pred.reshape(-1)

    rows = (total + lane_pad) // LANES
    yt2 = flat_t.reshape(rows, LANES)
    yp2 = flat_p.reshape(rows, LANES)

    rows_k = (rows // CHUNK) * CHUNK   # rows handled by the kernel
    tail_rows = rows - rows_k          # < CHUNK rows, handled in the tiny epilogue

    if rows_k > 0:
        max_tile = MAX_TILE_R_16 if jnp.dtype(dtype).itemsize <= 2 else MAX_TILE_R_32
        tile_r = min(max_tile, rows_k)                    # multiple of CHUNK
        num_blocks = pl.cdiv(rows_k, tile_r)
        valid_last = rows_k - (num_blocks - 1) * tile_r   # multiple of CHUNK, >= CHUNK
        kernel = functools.partial(
            _partials_kernel,
            num_blocks=num_blocks,
            chunks_full=tile_r // CHUNK,
            chunks_last=valid_last // CHUNK)

        parts = pl.pallas_call(
            kernel,
            out_shape=jax.ShapeDtypeStruct((num_blocks, 40, LANES), jnp.float32),
            grid_spec=pltpu.PrefetchScalarGridSpec(
                num_scalar_prefetch=0,
                grid=(num_blocks,),
                in_specs=[
                    pl.BlockSpec((tile_r, LANES), lambda i: (i, 0)),
                    pl.BlockSpec((tile_r, LANES), lambda i: (i, 0)),
                ],
                out_specs=pl.BlockSpec((None, 40, LANES), lambda i: (i, 0, 0)),
            ),
            compiler_params=pltpu.CompilerParams(
                # Per-block partials, no carried state -> megacore-shardable.
                dimension_semantics=("parallel",),
            ),
        )(yt2, yp2)

        k_sq = jnp.sum(parts[:, 0:8, :])
        k_min_t = jnp.min(parts[:, 8:16, :])
        k_max_t = jnp.max(parts[:, 16:24, :])
        k_min_p = jnp.min(parts[:, 24:32, :])
        k_max_p = jnp.max(parts[:, 32:40, :])
    else:
        k_sq = jnp.float32(0.0)
        k_min_t = k_max_t = k_min_p = k_max_p = jnp.float32(-1.0)

    if tail_rows > 0:
        # Tiny ragged row-tail (< 2048 elements): plain JAX, negligible traffic.
        tt = yt2[rows_k:, :].astype(jnp.float32)
        tp = yp2[rows_k:, :].astype(jnp.float32)
        d = tt - tp
        t_sq = jnp.sum(d * d)
        t_min_t, t_max_t = jnp.min(tt), jnp.max(tt)
        t_min_p, t_max_p = jnp.min(tp), jnp.max(tp)
    else:
        t_sq = jnp.float32(0.0)
        t_min_t = t_max_t = t_min_p = t_max_p = jnp.float32(-1.0)

    sq_sum = k_sq + t_sq
    min_t = jnp.minimum(k_min_t, t_min_t)
    max_t = jnp.maximum(k_max_t, t_max_t)
    min_p = jnp.minimum(k_min_p, t_min_p)
    max_p = jnp.maximum(k_max_p, t_max_p)

    loss = jnp.float32(0.5) * sq_sum / jnp.float32(total)
    is_sentinel = jnp.logical_or(
        jnp.logical_and(min_t == -1.0, max_t == -1.0),
        jnp.logical_and(min_p == -1.0, max_p == -1.0))
    return jnp.where(is_sentinel, jnp.float32(0.0), loss)


if __name__ == "__main__":
    key = jax.random.PRNGKey(0)
    k1, k2, k3, k4, k5, k6 = jax.random.split(key, 6)

    # Value-prediction-shaped tensors: batch=2, seq=16, hidden=64 -> 2048 elems
    # (128-aligned: zero-copy reshape path).
    y_true = jax.random.normal(k1, (2, 16, 64), dtype=jnp.float32)
    y_pred = jax.random.normal(k2, (2, 16, 64), dtype=jnp.float32)
    loss = jax.block_until_ready(custom_value_distance_loss(y_true, y_pred))
    ref = 0.5 * jnp.mean((y_true - y_pred) ** 2)
    assert jnp.allclose(loss, ref, rtol=1e-5, atol=1e-6), (loss, ref)

    # Larger aligned case exercising the multi-chunk fori_loop (4*32*128 = 16384).
    a_big = jax.random.normal(k5, (4, 32, 128), dtype=jnp.float32)
    b_big = jax.random.normal(k6, (4, 32, 128), dtype=jnp.float32)
    loss_big = jax.block_until_ready(custom_value_distance_loss(a_big, b_big))
    ref_big = 0.5 * jnp.mean((a_big - b_big) ** 2)
    assert jnp.allclose(loss_big, ref_big, rtol=1e-5, atol=1e-6), (loss_big, ref_big)

    # Ragged size (2100 elems): exercises the lane-pad + JAX row-tail path.
    a = jax.random.normal(k3, (3, 7, 100), dtype=jnp.float32)
    b = jax.random.normal(k4, (3, 7, 100), dtype=jnp.float32)
    loss2 = jax.block_until_ready(custom_value_distance_loss(a, b))
    ref2 = 0.5 * jnp.mean((a - b) ** 2)
    assert jnp.allclose(loss2, ref2, rtol=1e-5, atol=1e-6), (loss2, ref2)

    # Native bf16 inputs (no pre-cast to f32: HBM traffic stays bf16).
    yt_bf = y_true.astype(jnp.bfloat16)
    yp_bf = y_pred.astype(jnp.bfloat16)
    loss3 = jax.block_until_ready(custom_value_distance_loss(yt_bf, yp_bf))
    ref3 = 0.5 * jnp.mean(
        (yt_bf.astype(jnp.float32) - yp_bf.astype(jnp.float32)) ** 2)
    assert jnp.allclose(loss3, ref3, rtol=1e-5, atol=1e-6), (loss3, ref3)

    # Sentinel path: y_true identically -1 -> loss 0.
    sentinel = jnp.full((2, 16, 64), -1.0, dtype=jnp.float32)
    zero_loss = jax.block_until_ready(custom_value_distance_loss(sentinel, y_pred))
    assert zero_loss == 0.0, zero_loss

    print("KERNEL_OK")
</pallas_src>

<mosaic_0001>
module attributes {stable_mosaic.version = 11 : i64} {
  func.func @_partials_kernel(%arg0: i32, %arg1: memref<16x128xf32, #tpu.memory_space<vmem>>, %arg2: memref<16x128xf32, #tpu.memory_space<vmem>>, %arg3: memref<1x40x128xf32, #tpu.memory_space<vmem>>) attributes {dimension_semantics = [#tpu.dimension_semantics<parallel>], iteration_bounds = array<i64: 1>, scalar_prefetch = 0 : i64, scratch_operands = 0 : i64, tpu.core_type = #tpu.core_type<tc>, window_params = [{transform_indices = @transform_0, window_bounds = array<i64: 16, 128>}, {transform_indices = @transform_1, window_bounds = array<i64: 16, 128>}, {transform_indices = @transform_2, window_bounds = array<i64: 1, 40, 128>}]} {
    %cst = arith.constant -1.000000e+00 : f32
    %0 = vector.broadcast %cst : f32 to vector<8x128xf32>
    %cst_0 = arith.constant 0.000000e+00 : f32
    %1 = vector.broadcast %cst_0 : f32 to vector<8x128xf32>
    %c0_i32 = arith.constant 0 : i32
    %c16_i32 = arith.constant 16 : i32
    %2 = arith.muli %c0_i32, %c16_i32 : i32
    %3 = tpu.assume_multiple %2, 16 : i32
    %4 = arith.index_cast %3 : i32 to index
    %c0 = arith.constant 0 : index
    %5 = vector.load %arg1[%4, %c0] : memref<16x128xf32, #tpu.memory_space<vmem>>, vector<16x128xf32>
    %6 = arith.index_cast %3 : i32 to index
    %c0_1 = arith.constant 0 : index
    %7 = vector.load %arg2[%6, %c0_1] : memref<16x128xf32, #tpu.memory_space<vmem>>, vector<16x128xf32>
    %8 = vector.shape_cast %5 : vector<16x128xf32> to vector<2x8x128xf32>
    %9 = vector.shape_cast %7 : vector<16x128xf32> to vector<2x8x128xf32>
    %10 = arith.subf %8, %9 : vector<2x8x128xf32>
    %11 = arith.mulf %10, %10 : vector<2x8x128xf32>
    %cst_2 = arith.constant dense<0.000000e+00> : vector<8x128xf32>
    %12 = vector.multi_reduction <add>, %11, %cst_2 [0] : vector<2x8x128xf32> to vector<8x128xf32>
    %13 = arith.addf %1, %12 : vector<8x128xf32>
    %cst_3 = arith.constant dense<0x7F800000> : vector<8x128xf32>
    %14 = vector.multi_reduction <minimumf>, %8, %cst_3 [0] : vector<2x8x128xf32> to vector<8x128xf32>
    %15 = arith.minimumf %0, %14 : vector<8x128xf32>
    %cst_4 = arith.constant dense<0xFF800000> : vector<8x128xf32>
    %16 = vector.multi_reduction <maximumf>, %8, %cst_4 [0] : vector<2x8x128xf32> to vector<8x128xf32>
    %17 = arith.maximumf %0, %16 : vector<8x128xf32>
    %cst_5 = arith.constant dense<0x7F800000> : vector<8x128xf32>
    %18 = vector.multi_reduction <minimumf>, %9, %cst_5 [0] : vector<2x8x128xf32> to vector<8x128xf32>
    %19 = arith.minimumf %0, %18 : vector<8x128xf32>
    %cst_6 = arith.constant dense<0xFF800000> : vector<8x128xf32>
    %20 = vector.multi_reduction <maximumf>, %9, %cst_6 [0] : vector<2x8x128xf32> to vector<8x128xf32>
    %21 = arith.maximumf %0, %20 : vector<8x128xf32>
    %c1_i32 = arith.constant 1 : i32
    %c0_7 = arith.constant 0 : index
    %c0_8 = arith.constant 0 : index
    %c0_9 = arith.constant 0 : index
    %22 = vector.load %arg3[%c0_7, %c0_8, %c0_9] : memref<1x40x128xf32, #tpu.memory_space<vmem>>, vector<1x8x128xf32>
    %23 = vector.shape_cast %22 : vector<1x8x128xf32> to vector<8x128xf32>
    %24 = vector.shape_cast %13 : vector<8x128xf32> to vector<1x8x128xf32>
    tpu.vector_store %arg3[%c0_7, %c0_8, %c0_9], %24 {strides = array<i32>} : memref<1x40x128xf32, #tpu.memory_space<vmem>>, vector<1x8x128xf32>,
    %c0_10 = arith.constant 0 : index
    %c8 = arith.constant 8 : index
    %c0_11 = arith.constant 0 : index
    %25 = vector.load %arg3[%c0_10, %c8, %c0_11] : memref<1x40x128xf32, #tpu.memory_space<vmem>>, vector<1x8x128xf32>
    %26 = vector.shape_cast %25 : vector<1x8x128xf32> to vector<8x128xf32>
    %27 = vector.shape_cast %15 : vector<8x128xf32> to vector<1x8x128xf32>
    tpu.vector_store %arg3[%c0_10, %c8, %c0_11], %27 {strides = array<i32>} : memref<1x40x128xf32, #tpu.memory_space<vmem>>, vector<1x8x128xf32>,
    %c0_12 = arith.constant 0 : index
    %c16 = arith.constant 16 : index
    %c0_13 = arith.constant 0 : index
    %28 = vector.load %arg3[%c0_12, %c16, %c0_13] : memref<1x40x128xf32, #tpu.memory_space<vmem>>, vector<1x8x128xf32>
    %29 = vector.shape_cast %28 : vector<1x8x128xf32> to vector<8x128xf32>
    %30 = vector.shape_cast %17 : vector<8x128xf32> to vector<1x8x128xf32>
    tpu.vector_store %arg3[%c0_12, %c16, %c0_13], %30 {strides = array<i32>} : memref<1x40x128xf32, #tpu.memory_space<vmem>>, vector<1x8x128xf32>,
    %c0_14 = arith.constant 0 : index
    %c24 = arith.constant 24 : index
    %c0_15 = arith.constant 0 : index
    %31 = vector.load %arg3[%c0_14, %c24, %c0_15] : memref<1x40x128xf32, #tpu.memory_space<vmem>>, vector<1x8x128xf32>
    %32 = vector.shape_cast %31 : vector<1x8x128xf32> to vector<8x128xf32>
    %33 = vector.shape_cast %19 : vector<8x128xf32> to vector<1x8x128xf32>
    tpu.vector_store %arg3[%c0_14, %c24, %c0_15], %33 {strides = array<i32>} : memref<1x40x128xf32, #tpu.memory_space<vmem>>, vector<1x8x128xf32>,
    %c0_16 = arith.constant 0 : index
    %c32 = arith.constant 32 : index
    %c0_17 = arith.constant 0 : index
    %34 = vector.load %arg3[%c0_16, %c32, %c0_17] : memref<1x40x128xf32, #tpu.memory_space<vmem>>, vector<1x8x128xf32>
    %35 = vector.shape_cast %34 : vector<1x8x128xf32> to vector<8x128xf32>
    %36 = vector.shape_cast %21 : vector<8x128xf32> to vector<1x8x128xf32>
    tpu.vector_store %arg3[%c0_16, %c32, %c0_17], %36 {strides = array<i32>} : memref<1x40x128xf32, #tpu.memory_space<vmem>>, vector<1x8x128xf32>,
    return
  }
  func.func @transform_0(%arg0: i32) -> (i32, i32) {
    %c0_i32 = arith.constant 0 : i32
    %c0_i32_0 = arith.constant 0 : i32
    return %arg0, %c0_i32 : i32, i32
  }
  func.func @transform_1(%arg0: i32) -> (i32, i32) {
    %c0_i32 = arith.constant 0 : i32
    %c0_i32_0 = arith.constant 0 : i32
    return %arg0, %c0_i32 : i32, i32
  }
  func.func @transform_2(%arg0: i32) -> (i32, i32, i32) {
    %c0_i32 = arith.constant 0 : i32
    %c0_i32_0 = arith.constant 0 : i32
    %c0_i32_1 = arith.constant 0 : i32
    return %arg0, %c0_i32, %c0_i32_0 : i32, i32, i32
  }
}

</mosaic_0001>

<bundles_post_ra>
// kernel: tpu_custom_call.1
= control target key start
LH: loop header
LB: loop body
LE: loop exit
PB: predicated region body
PF: predicated region fallthrough
CT: control target
= control target key end

     0   :  { %7 = vsyncpa [#allocation3], 0  ;;  %s208_s0 = inlined_call_operand.hbm [shape: f32[16,128], index: 0, kind: input, shape index: {}]   ;;  %s209_s1 = inlined_call_operand.hbm [shape: f32[16,128], index: 1, kind: input, shape index: {}]   ;;  %s210_s2 = inlined_call_operand.hbm [shape: f32[1,40,128], index: 2, kind: output, shape index: {}]  }
   0x1   :  { %8 = vsyncpa [#allocation6], 0 }
   0x2   :  { %9 = vsyncpa [#allocation4], 0  ;;  %s14_s11 = sshll.u32 %s208_s0, 4  ;;  %s170_s12 = smov [#allocation2]   ;;  %s15_s11 = int_to_ptr.hbm [resolvable:$true] %s14_s11 }
   0x3   :  { %s16_s13 = sshll.u32 %s170_s12, 4  ;;  %s27_s16 = sshll.u32 %s209_s1, 4  ;;  %s17_s13 = int_to_ptr.vmem [resolvable:$true] %s16_s13  ;;  %s28_s16 = int_to_ptr.hbm [resolvable:$true] %s27_s16 }
   0x4   :  { %s171_s17 = smov 128   ;;  %s172_s18 = smov 8  }
   0x5   :  { %22 = dma.hbm_to_vmem [thread:$0]  %s15_s11, 256, %s17_s13, [#allocation3], %s171_s17, %s171_s17, %s172_s18  }
   0x6   :  { %s173_s19 = smov [#allocation5]  }
   0x7   :  { %s29_s20 = sshll.u32 %s173_s19, 4  ;;  %s30_s20 = int_to_ptr.vmem [resolvable:$true] %s29_s20 }
   0x8   :  { %35 = dma.hbm_to_vmem [thread:$0]  %s28_s16, 256, %s30_s20, [#allocation6], %s171_s17, %s171_s17, %s172_s18  }
   0x9   :  { %164 = dma.done.wait [#allocation3], 256  }
   0xa   :  { %165 = vsyncadd [#allocation3], 4294967040 }
   0xb   :  { %166 = dma.done.wait [#allocation6], 256  }
   0xc   :  { %167 = vsyncadd [#allocation6], 4294967040  ;;  %v44_v0 = vld [vmem:[#allocation2] sm:$0xff]  ;;  %v45_v1 = vld [vmem:[#allocation2 + $0x8] sm:$0xff]  ;;  %s174_s0 = smov [#allocation7]   ;;  %s73_s23 = sshll.u32 %s210_s2, 4  ;;  %s74_s23 = int_to_ptr.hbm [resolvable:$true] %s73_s23 }
   0xd   :  { %v46_v2 = vld [vmem:[#allocation5] sm:$0xff]  ;;  %v47_v3 = vld [vmem:[#allocation5 + $0x8] sm:$0xff]  ;;  %v54_v5 = vmin.f32 %v44_v0, %v45_v1  ;;  %v56_v6 = vmax.f32 %v44_v0, %v45_v1  ;;  %s71_s1 = sshll.u32 %s174_s0, 4  ;;  %s72_s1 = int_to_ptr.vmem [resolvable:$true] %s71_s1 }
   0xe   :  { %v48_v4 = vsub.f32 %v44_v0, %v46_v2  ;;  %v49_v7 = vsub.f32 %v45_v1, %v47_v3  ;;  %v58_v8 = vmin.f32 %v46_v2, %v47_v3  ;;  %v60_v9 = vmax.f32 %v46_v2, %v47_v3 }
   0xf   :  { %v55_v11 = vmin.f32 %v54_v5, -1.0  ;;  %v57_v12 = vmax.f32 %v56_v6, -1.0 }
  0x10   :  { %v50_v10 = vmul.f32 %v48_v4, %v48_v4  ;;  %v51_v13 = vmul.f32 %v49_v7, %v49_v7  ;;  %v59_v14 = vmin.f32 %v58_v8, -1.0  ;;  %v61_v15 = vmax.f32 %v60_v9, -1.0 }
  0x11   :  { %63 = vst [vmem:[#allocation7 + $0x8] sm:$0xff] %v55_v11 }
  0x12   :  { %v52_v16 = vadd.f32 %v51_v13, %v50_v10  ;;  %64 = vst [vmem:[#allocation7 + $0x10] sm:$0xff] %v57_v12 }
  0x13   :  { %65 = vst [vmem:[#allocation7 + $0x18] sm:$0xff] %v59_v14 }
  0x14   :  { %62 = vst [vmem:[#allocation7] sm:$0xff] %v52_v16 }
  0x15   :  { %66 = vst [vmem:[#allocation7 + $0x20] sm:$0xff] %v61_v15 }
  0x16   :  { %79 = dma.vmem_to_hbm [thread:$0]  %s72_s1, 640, %s74_s23, [#allocation4], %s171_s17, %s171_s17, %s172_s18  }
  0x17   :  { %168 = dma.done.wait [#allocation4], 640  }
  0x18   :  { %169 = vsyncadd [#allocation4], 4294966656 }
  0x19   :  { %84 = vsyncpa [#allocation3], 1 }
  0x1a   :  { %85 = vsyncpa [#allocation6], 1 }
  0x1b   :  { %86 = vsyncpa [#allocation4], 1 }

</bundles_post_ra>
